<compile_context>
chip_gen: v6e
topology: v6e:2x2x1
jax: 0.10.0
libtpu: 0.0.40
codegen_flags: <defaults>
</compile_context>

<pallas_src>
import functools

import jax
import jax.numpy as jnp
import numpy as np
from jax.experimental import pallas as pl
from jax.experimental.pallas import tpu as pltpu


def _round_up(x: int, m: int) -> int:
    return ((x + m - 1) // m) * m


def _choose_row_tile(n: int, dim: int, n_embed: int,
                     x_itemsize: int, e_itemsize: int) -> int:
    """Pick the largest row tile that fits a conservative VMEM budget."""
    # Per-row live bytes: double-buffered x-in + q-out tiles, f32 score /
    # one-hot / iota intermediates, f32 q / diff temporaries (conservative).
    per_row = 4 * dim * x_itemsize + 12 * n_embed + 16 * dim
    const = 2 * dim * n_embed * e_itemsize + 8 * n_embed + 4096
    budget = 20 * 1024 * 1024                      # headroom under 32 MiB scoped
    tn = (budget - const) // per_row if budget > const else 8
    tn = min(int(tn), 1024)
    # Keep >= 2 grid blocks when possible (both v7x TensorCores busy).
    tn = min(tn, _round_up(pl.cdiv(n, 2), 8))
    tn = max(8, (tn // 8) * 8)
    return int(tn)


def _vq_kernel(x_ref, embed_ref, bias_ref,          # inputs
               q_ref, counts_ref, sse_ref,          # outputs
               *, n_valid: int, apply_mask: bool):
    tn, dim = x_ref.shape
    n_embed = embed_ref.shape[1]

    x = x_ref[...]                                  # (tn, D), native dtype
    emb = embed_ref[...]                            # (D, K),  native dtype

    if apply_mask:
        i = pl.program_id(0)
        row_ids = i * tn + jax.lax.broadcasted_iota(jnp.int32, (tn, 1), 0)
        row_valid = row_ids < n_valid               # (tn, 1) bool
        # Zero garbage rows of the partial last block (jnp.where -> NaN-safe).
        x = jnp.where(row_valid, x, jnp.zeros_like(x))
        valid_row = (i * tn + jax.lax.broadcasted_iota(jnp.int32, (1, tn), 1)
                     < n_valid).astype(jnp.float32)  # (1, tn)
    else:
        valid_row = jnp.ones((1, tn), jnp.float32)

    # Nearest code: argmax(x @ e - 0.5*||e||^2).  The per-row ||x||^2 term is
    # a constant w.r.t. the argmax and is dropped; the bias is precomputed in
    # the wrapper and kept in f32.
    score = jnp.dot(x, emb, preferred_element_type=jnp.float32) + bias_ref[...]
    idx = jnp.argmax(score, axis=1, keepdims=True).astype(jnp.int32)   # (tn, 1)

    onehot = (jax.lax.broadcasted_iota(jnp.int32, (tn, n_embed), 1)
              == idx).astype(emb.dtype)             # exact 0/1 weights

    # Codebook lookup as an MXU matmul against the SAME (D, K) buffer:
    # contract onehot's K with emb's K  ->  (tn, D).  Exact (one-hot).
    q = jax.lax.dot_general(onehot, emb,
                            dimension_numbers=(((1,), (1,)), ((), ())),
                            preferred_element_type=jnp.float32)
    q_ref[...] = q.astype(q_ref.dtype)

    # Per-block partials.  Masking + cross-row reduction are fused into thin
    # (1,tn) @ (tn,*) MXU matmuls so the XLU (busy with the argmax) stays free.
    diff = q - x.astype(jnp.float32)
    counts_ref[...] = jnp.dot(valid_row.astype(onehot.dtype), onehot,
                              preferred_element_type=jnp.float32)
    sse_ref[...] = jnp.dot(valid_row, diff * diff,
                           preferred_element_type=jnp.float32)


def vector_quantize_forward(x, embed, *, commitment: float = 1.0):
    """x: (..., dim) float, embed: (dim, n_embed) float (the PyTorch buffer).

    Returns (quantize, loss, perplexity) matching VectorQuantize.forward in
    eval mode (the straight-through quantize value == codebook lookup).
    """
    dim, n_embed = embed.shape
    orig_shape = x.shape
    flat = x.reshape(-1, dim)
    n = flat.shape[0]

    # Ship the codebook once, in the compute dtype of x (native MXU rate).
    embed_c = embed.astype(x.dtype)
    # -0.5 * ||e||^2 bias, kept in f32 for the score accumulation.
    emb_f32 = embed.astype(jnp.float32)
    bias = -0.5 * jnp.sum(emb_f32 * emb_f32, axis=0, keepdims=True)   # (1, K)

    x_isz = jnp.dtype(x.dtype).itemsize
    e_isz = jnp.dtype(embed_c.dtype).itemsize
    tn = _choose_row_tile(n, dim, n_embed, x_isz, e_isz)
    nblocks = pl.cdiv(n, tn)
    apply_mask = (n % tn) != 0

    kernel = functools.partial(_vq_kernel, n_valid=n, apply_mask=apply_mask)

    cost = pl.CostEstimate(
        flops=4 * n * dim * n_embed + 2 * n * (dim + n_embed),
        transcendentals=0,
        bytes_accessed=2 * n * dim * x_isz            # x read + q write
                       + dim * n_embed * e_isz        # codebook (once)
                       + n_embed * 4                  # bias
                       + nblocks * (n_embed + dim) * 4,
    )

    q_flat, counts, sse = pl.pallas_call(
        kernel,
        out_shape=(
            jax.ShapeDtypeStruct((n, dim), x.dtype),                   # quantize
            jax.ShapeDtypeStruct((nblocks, 1, n_embed), jnp.float32),  # counts
            jax.ShapeDtypeStruct((nblocks, 1, dim), jnp.float32),      # sse rows
        ),
        grid_spec=pltpu.PrefetchScalarGridSpec(
            num_scalar_prefetch=0,
            grid=(nblocks,),
            in_specs=[
                pl.BlockSpec((tn, dim), lambda i: (i, 0)),       # x tile
                pl.BlockSpec((dim, n_embed), lambda i: (0, 0)),  # codebook (once)
                pl.BlockSpec((1, n_embed), lambda i: (0, 0)),    # -0.5*||e||^2
            ],
            out_specs=[
                pl.BlockSpec((tn, dim), lambda i: (i, 0)),
                pl.BlockSpec((None, 1, n_embed), lambda i: (i, 0, 0)),
                pl.BlockSpec((None, 1, dim), lambda i: (i, 0, 0)),
            ],
        ),
        compiler_params=pltpu.CompilerParams(
            dimension_semantics=("parallel",),        # no cross-step state
            vmem_limit_bytes=32 * 1024 * 1024,
        ),
        cost_estimate=cost,
    )(flat, embed_c, bias)

    quantize = q_flat.reshape(orig_shape)

    n_f = jnp.float32(n)
    loss = (jnp.sum(sse) / (n_f * dim)) * commitment
    avg_probs = jnp.sum(counts, axis=(0, 1)) / n_f                    # (K,)
    perplexity = jnp.exp(-jnp.sum(avg_probs * jnp.log(avg_probs + 1e-10)))
    return quantize, loss, perplexity


def _reference_forward(x, embed, commitment=1.0):
    """Pure-JAX reference mirroring the PyTorch forward (eval mode)."""
    dim = embed.shape[0]
    flatten = x.reshape(-1, dim)
    dist = (jnp.sum(flatten ** 2, axis=1, keepdims=True)
            - 2.0 * flatten @ embed
            + jnp.sum(embed ** 2, axis=0, keepdims=True))
    embed_ind = jnp.argmax(-dist, axis=1)
    onehot = jax.nn.one_hot(embed_ind, embed.shape[1], dtype=x.dtype)
    quantize = embed.T[embed_ind].reshape(x.shape)
    loss = jnp.mean((quantize - x) ** 2) * commitment
    avg_probs = jnp.mean(onehot, axis=0)
    perplexity = jnp.exp(-jnp.sum(avg_probs * jnp.log(avg_probs + 1e-10)))
    return quantize, loss, perplexity


if __name__ == "__main__":
    dim = 32
    codebook_size = 128       # n_embed defaults to codebook_size

    key = jax.random.PRNGKey(0)
    k_embed, k_x1, k_x2 = jax.random.split(key, 3)
    embed = jax.random.normal(k_embed, (dim, codebook_size), dtype=jnp.float32)

    # Case 1: batch=2, seq=8  -> 16 rows (tile divides evenly, 2 blocks).
    x1 = jax.random.normal(k_x1, (2, 8, dim), dtype=jnp.float32)
    # Case 2: batch=3, seq=7  -> 21 rows (partial last block, exercises the
    # mask + out-of-bounds-store-drop path the perf review asked to test).
    x2 = jax.random.normal(k_x2, (3, 7, dim), dtype=jnp.float32)

    for x in (x1, x2):
        quantize, loss, ppl = vector_quantize_forward(x, embed, commitment=1.0)
        jax.block_until_ready((quantize, loss, ppl))

        q_ref, loss_ref, ppl_ref = _reference_forward(x, embed, commitment=1.0)
        np.testing.assert_allclose(np.asarray(quantize), np.asarray(q_ref),
                                   rtol=1e-5, atol=1e-5)
        np.testing.assert_allclose(float(loss), float(loss_ref),
                                   rtol=1e-5, atol=1e-6)
        np.testing.assert_allclose(float(ppl), float(ppl_ref),
                                   rtol=1e-5, atol=1e-5)

    print("KERNEL_OK")
</pallas_src>

<mosaic_0001>
module attributes {stable_mosaic.version = 11 : i64} {
  func.func @_vq_kernel(%arg0: i32, %arg1: memref<8x32xf32, #tpu.memory_space<vmem>>, %arg2: memref<32x128xf32, #tpu.memory_space<vmem>>, %arg3: memref<1x128xf32, #tpu.memory_space<vmem>>, %arg4: memref<8x32xf32, #tpu.memory_space<vmem>>, %arg5: memref<1x1x128xf32, #tpu.memory_space<vmem>>, %arg6: memref<1x1x32xf32, #tpu.memory_space<vmem>>) attributes {dimension_semantics = [#tpu.dimension_semantics<parallel>], iteration_bounds = array<i64: 2>, scalar_prefetch = 0 : i64, scratch_operands = 0 : i64, tpu.core_type = #tpu.core_type<tc>, window_params = [{transform_indices = @transform_0, window_bounds = array<i64: 8, 32>}, {pipeline_mode = #tpu.pipeline_mode<synchronous>, transform_indices = @transform_1, window_bounds = array<i64: 32, 128>}, {pipeline_mode = #tpu.pipeline_mode<synchronous>, transform_indices = @transform_2, window_bounds = array<i64: 1, 128>}, {transform_indices = @transform_3, window_bounds = array<i64: 8, 32>}, {transform_indices = @transform_4, window_bounds = array<i64: 1, 1, 128>}, {transform_indices = @transform_5, window_bounds = array<i64: 1, 1, 32>}]} {
    %c0 = arith.constant 0 : index
    %c0_0 = arith.constant 0 : index
    %0 = vector.load %arg1[%c0, %c0_0] : memref<8x32xf32, #tpu.memory_space<vmem>>, vector<8x32xf32>
    %c0_1 = arith.constant 0 : index
    %c0_2 = arith.constant 0 : index
    %1 = vector.load %arg2[%c0_1, %c0_2] : memref<32x128xf32, #tpu.memory_space<vmem>>, vector<32x128xf32>
    %cst = arith.constant 1.000000e+00 : f32
    %2 = vector.broadcast %cst : f32 to vector<1x8xf32>
    %cst_3 = arith.constant dense<0.000000e+00> : vector<8x128xf32>
    %3 = tpu.matmul %0, %1, %cst_3 {dimension_numbers = #tpu.dot_dimension_numbers<[1], [0], [0], [1], [0, 0, 1, 1], [], []>} : vector<8x32xf32>, vector<32x128xf32>, vector<8x128xf32> -> vector<8x128xf32>
    %c0_4 = arith.constant 0 : index
    %c0_5 = arith.constant 0 : index
    %4 = vector.load %arg3[%c0_4, %c0_5] : memref<1x128xf32, #tpu.memory_space<vmem>>, vector<1x128xf32>
    %5 = vector.broadcast %4 : vector<1x128xf32> to vector<8x128xf32>
    %6 = arith.addf %3, %5 : vector<8x128xf32>
    %7 = tpu.reduce_index %6 {axis = 1 : i32, kind = #tpu.reduction_kind<arg_max>} : vector<8x128xf32> -> vector<8xi32>
    %8 = vector.shape_cast %7 : vector<8xi32> to vector<8x1xi32>
    %9 = tpu.iota {dimensions = array<i32: 1>} : vector<8x128xi32>
    %10 = vector.broadcast %8 : vector<8x1xi32> to vector<8x128xi32>
    %11 = arith.cmpi eq, %9, %10 : vector<8x128xi32>
    %12 = arith.extui %11 : vector<8x128xi1> to vector<8x128xi32>
    %13 = arith.sitofp %12 : vector<8x128xi32> to vector<8x128xf32>
    %cst_6 = arith.constant dense<0.000000e+00> : vector<8x32xf32>
    %14 = tpu.matmul %13, %1, %cst_6 {dimension_numbers = #tpu.dot_dimension_numbers<[1], [1], [0], [0], [0, 0, 1, 0], [], []>} : vector<8x128xf32>, vector<32x128xf32>, vector<8x32xf32> -> vector<8x32xf32>
    %c0_7 = arith.constant 0 : index
    %c0_8 = arith.constant 0 : index
    %15 = vector.load %arg4[%c0_7, %c0_8] : memref<8x32xf32, #tpu.memory_space<vmem>>, vector<8x32xf32>
    tpu.vector_store %arg4[%c0_7, %c0_8], %14 {strides = array<i32>} : memref<8x32xf32, #tpu.memory_space<vmem>>, vector<8x32xf32>,
    %16 = arith.subf %14, %0 : vector<8x32xf32>
    %cst_9 = arith.constant dense<0.000000e+00> : vector<1x128xf32>
    %17 = tpu.matmul %2, %13, %cst_9 {dimension_numbers = #tpu.dot_dimension_numbers<[1], [0], [0], [1], [0, 0, 1, 1], [], []>} : vector<1x8xf32>, vector<8x128xf32>, vector<1x128xf32> -> vector<1x128xf32>
    %c0_10 = arith.constant 0 : index
    %c0_11 = arith.constant 0 : index
    %c0_12 = arith.constant 0 : index
    %18 = vector.load %arg5[%c0_10, %c0_11, %c0_12] : memref<1x1x128xf32, #tpu.memory_space<vmem>>, vector<1x1x128xf32>
    %19 = vector.shape_cast %18 : vector<1x1x128xf32> to vector<1x128xf32>
    %20 = vector.shape_cast %17 : vector<1x128xf32> to vector<1x1x128xf32>
    tpu.vector_store %arg5[%c0_10, %c0_11, %c0_12], %20 {strides = array<i32>} : memref<1x1x128xf32, #tpu.memory_space<vmem>>, vector<1x1x128xf32>,
    %21 = arith.mulf %16, %16 : vector<8x32xf32>
    %cst_13 = arith.constant dense<0.000000e+00> : vector<1x32xf32>
    %22 = tpu.matmul %2, %21, %cst_13 {dimension_numbers = #tpu.dot_dimension_numbers<[1], [0], [0], [1], [0, 0, 1, 1], [], []>} : vector<1x8xf32>, vector<8x32xf32>, vector<1x32xf32> -> vector<1x32xf32>
    %c0_14 = arith.constant 0 : index
    %c0_15 = arith.constant 0 : index
    %c0_16 = arith.constant 0 : index
    %23 = vector.load %arg6[%c0_14, %c0_15, %c0_16] : memref<1x1x32xf32, #tpu.memory_space<vmem>>, vector<1x1x32xf32>
    %24 = vector.shape_cast %23 : vector<1x1x32xf32> to vector<1x32xf32>
    %25 = vector.shape_cast %22 : vector<1x32xf32> to vector<1x1x32xf32>
    tpu.vector_store %arg6[%c0_14, %c0_15, %c0_16], %25 {strides = array<i32>} : memref<1x1x32xf32, #tpu.memory_space<vmem>>, vector<1x1x32xf32>,
    return
  }
  func.func @transform_0(%arg0: i32) -> (i32, i32) {
    %c0_i32 = arith.constant 0 : i32
    %c0_i32_0 = arith.constant 0 : i32
    return %arg0, %c0_i32 : i32, i32
  }
  func.func @transform_1(%arg0: i32) -> (i32, i32) {
    %c0_i32 = arith.constant 0 : i32
    %c0_i32_0 = arith.constant 0 : i32
    %c0_i32_1 = arith.constant 0 : i32
    return %c0_i32, %c0_i32_0 : i32, i32
  }
  func.func @transform_2(%arg0: i32) -> (i32, i32) {
    %c0_i32 = arith.constant 0 : i32
    %c0_i32_0 = arith.constant 0 : i32
    %c0_i32_1 = arith.constant 0 : i32
    return %c0_i32, %c0_i32_0 : i32, i32
  }
  func.func @transform_3(%arg0: i32) -> (i32, i32) {
    %c0_i32 = arith.constant 0 : i32
    %c0_i32_0 = arith.constant 0 : i32
    return %arg0, %c0_i32 : i32, i32
  }
  func.func @transform_4(%arg0: i32) -> (i32, i32, i32) {
    %c0_i32 = arith.constant 0 : i32
    %c0_i32_0 = arith.constant 0 : i32
    %c0_i32_1 = arith.constant 0 : i32
    return %arg0, %c0_i32, %c0_i32_0 : i32, i32, i32
  }
  func.func @transform_5(%arg0: i32) -> (i32, i32, i32) {
    %c0_i32 = arith.constant 0 : i32
    %c0_i32_0 = arith.constant 0 : i32
    %c0_i32_1 = arith.constant 0 : i32
    return %arg0, %c0_i32, %c0_i32_0 : i32, i32, i32
  }
}

</mosaic_0001>

<bundles_post_ra>
// kernel: tpu_custom_call.1
= control target key start
LH: loop header
LB: loop body
LE: loop exit
PB: predicated region body
PF: predicated region fallthrough
CT: control target
= control target key end

     0   :  { %11 = vsyncpa [#allocation3], 0  ;;  %s1355_s0 = inlined_call_operand.hbm [shape: f32[16,32], index: 0, kind: input, shape index: {}]   ;;  %s1356_s1 = inlined_call_operand.hbm [shape: f32[32,128], index: 1, kind: input, shape index: {}]   ;;  %s1357_s2 = inlined_call_operand.vmem [shape: f32[1,128], index: 2, kind: input, shape index: {}]   ;;  %s1358_s3 = inlined_call_operand.hbm [shape: f32[16,32], index: 3, kind: output, shape index: {0}]   ;;  %s1359_s4 = inlined_call_operand.hbm [shape: f32[2,1,128], index: 4, kind: output, shape index: {1}]   ;;  %s1360_s5 = inlined_call_operand.hbm [shape: f32[2,1,32], index: 5, kind: output, shape index: {2}]  }
   0x1   :  { %13 = vsyncpa [#allocation3 + $0x1], 0 }
   0x2   :  { %14 = vsyncpa [#allocation6], 0 }
   0x3   :  { %15 = vsyncpa [#allocation4], 0 }
   0x4   :  { %17 = vsyncpa [#allocation4 + $0x1], 0 }
   0x5   :  { %18 = vsyncpa [#allocation9], 0 }
   0x6   :  { %20 = vsyncpa [#allocation9 + $0x1], 0  ;;  %s1126_s18 = smov 0   ;;  %s1128_s19 = smov 0  }
   0x7   :  { %s1130_s20 = smov 0   ;;  %s1132_s21 = smov 0  }
   0x8 LB: > { %s1147_s22 = sadd.s32 4294967295, %s1084_s21   ;;  %s1363_s23 = sadd.s32 4294967294, %s1084_s21   ;;  %s1084_s21 = sphi %s1132_s21, %s1384_s21   ;;  %s1080_s20 = sphi %s1130_s20, %s1383_s20   ;;  %s1076_s19 = sphi %s1128_s19, %s1382_s19   ;;  %s1072_s18 = sphi %s1126_s18, %s1381_s18  }
   0x9   : > { %p46_p0 = scmp.ne.s32.totalorder %s1076_s19, %s1072_s18  ;;  %p1361_p1 = scmp.eq.s32.totalorder %s1147_s22, 0 }
   0xa   : > { %p118_p3 = scmp.eq.s32.totalorder %s1363_s23, 1  ;;  %p766_p5 = scmp.ge.s32.totalorder %s1084_s21, 1 }
   0xb   : > { %p1158_p4 = por %p1361_p1, %p46_p0  ;;  %p177_p7 = scmp.lt.s32.totalorder %s1084_s21, 3 }
   0xc   : > { %p1163_p6 = por %p118_p3, %p46_p0  ;;  %s1086_s27 = smov [#allocation5]  }
   0xd   : > { %s1366_s24 = scalar_select %p1158_p4, 1, 0 }
   0xe   : > { %s1367_s25 = scalar_select %p1163_p6, 1, 0 }
   0xf   : > { %p1168_p8 = pnand %p766_p5, %p177_p7  ;;  %s189_s28 = sshll.u32 %s1086_s27, 4  ;;  %s190_s28 = int_to_ptr.vmem [resolvable:$true] %s189_s28 }
  0x10   : > { %s1182_s30 = sadd.s32 1, %s1084_s21   ;;  %s33_s6 = sadd.s32 1, %s1080_s20 }
  0x11   : > { %s1368_s26 = scalar_select %p1168_p8, 1, 0 }
  0x12   : > { %p846_p9 = pneg %p1168_p8  ;;  %s30_s7 = ssub.s32 %s1084_s21, %s1182_s30 }
  0x13   : > { %s917_s8 = scalar_lea.vmem %s190_s28, 512  ;;  %p925_p5 = scmp.lt.s32.totalorder %s190_s28, %s190_s28 }
  0x14   : > { %p1177_p11 = pnand %p846_p9, %p1361_p1  ;;  %p918_p13 = scmp.ne.s32.totalorder %s190_s28, %s917_s8 }
  0x15   : > { %p926_p7 = scmp.lt.s32.totalorder %s917_s8, %s917_s8 }
  0x16   : > { %p908_p12 = pneg %p1177_p11 }
  0x17   : > { %p927_p10 = por %p926_p7, %p925_p5 }
  0x18   : > { %p920_p0 = pnand %p918_p13, %p908_p12 }
  0x1a   : > { %p921_p3 = pneg %p920_p0 }
  0x1c   : > { %p928_p2 = pnand %p927_p10, %p921_p3 }
  0x1e   : > { %931 = shalt.err (!%p928_p2)
}
  0x1f   : > { %s1087_s9 = smov 128   ;;  %s1088_s10 = smov 8  }
  0x20   : > { %849 = dma.hbm_to_vmem [thread:$0]  (!%p1177_p11), %s1356_s1, 512, %s190_s28, [#allocation6], %s1087_s9, %s1087_s9, %s1088_s10  }
  0x21   : > { %p31_p9 = scmp.eq.s32.totalorder %s30_s7, 0  ;;  %p40_p12 = scmp.ne.s32.totalorder %s1080_s20, %s1076_s19 }
  0x22   : > { %p41_p10 = scmp.eq.s32.totalorder %s1084_s21, 0  ;;  %p865_p2 = scmp.lt.s32.totalorder %s1084_s21, 2 }
  0x23   : > { %s1199_s13 = scalar_select %p31_p9, %s1080_s20, %s33_s6  }
  0x24   : > { %p42_p13 = por %p41_p10, %p40_p12  ;;  %p1370_p0 = scmp.eq.s32.totalorder %s1147_s22, 1 }
  0x25   : > { %s206_s15 = sand.u32 1, %s1080_s20   ;;  %s770_s16 = sshll.u32 %s1084_s21, 7 }
  0x26   : > { %p1203_p3 = por %p1370_p0, %p40_p12  ;;  %s769_s17 = sshll.u32 %s206_s15, 3 }
  0x27   : > { %s1212_s8 = scalar_lea.hbm %s1355_s0, %s770_s16  ;;  %s210_s28 = scalar_lea.vmem [#allocation2], %s769_s17 }
  0x28   : > { %s1371_s14 = scalar_select %p1203_p3, 1, 0 }
  0x29   : > { %s217_s6 = sshll.u32 %s210_s28, 4  ;;  %p1214_p11 = pnand %p865_p2, %p42_p13  ;;  %s218_s6 = int_to_ptr.vmem [resolvable:$true] %s217_s6 }
  0x2a   : > { %s207_s9 = scalar_lea.sflag [#allocation3], %s206_s15  ;;  %s932_s10 = scalar_lea.hbm %s1212_s8, 128 }
  0x2b   : > { %p933_p5 = scmp.ne.s32.totalorder %s1212_s8, %s932_s10  ;;  %p934_p7 = pneg %p1214_p11 }
  0x2c   : > { %s937_s16 = scalar_lea.hbm %s1355_s0, 256  ;;  %p938_p10 = scmp.lt.s32.totalorder %s1212_s8, %s1355_s0 }
  0x2d   : > { %p935_p9 = pnand %p934_p7, %p933_p5  ;;  %p939_p2 = scmp.lt.s32.totalorder %s937_s16, %s932_s10 }
  0x2f   : > { %p936_p12 = pneg %p935_p9  ;;  %p940_p13 = por %p939_p2, %p938_p10 }
  0x31   : > { %p941_p0 = pnand %p940_p13, %p936_p12 }
  0x33   : > { %944 = shalt.err (!%p941_p0)
}
  0x34   : > { %s945_s29 = scalar_lea.vmem %s218_s6, 128  ;;  %s1089_s15 = smov [#allocation2]  }
  0x35   : > { %p946_p1 = scmp.ne.s32.totalorder %s218_s6, %s945_s29  ;;  %s950_s28 = sshll.u32 %s1089_s15, 4  ;;  %s951_s28 = int_to_ptr.vmem [resolvable:$false] %s950_s28 }
  0x36   : > { %s952_s23 = scalar_lea.vmem %s951_s28, 256  ;;  %p953_p5 = scmp.lt.s32.totalorder %s218_s6, %s951_s28 }
  0x37   : > { %p948_p6 = pnand %p946_p1, %p934_p7  ;;  %p954_p9 = scmp.lt.s32.totalorder %s952_s23, %s945_s29 }
  0x39   : > { %p949_p3 = pneg %p948_p6  ;;  %p955_p4 = por %p954_p9, %p953_p5 }
  0x3b   : > { %p956_p8 = pnand %p955_p4, %p949_p3 }
  0x3d   : > { %959 = shalt.err (!%p956_p8)
}
  0x3e   : > { %853 = dma.hbm_to_vmem [thread:$0]  (!%p1214_p11), %s1212_s8, 128, %s218_s6, %s207_s9  }
  0x3f   : > { %p1373_p12 = scmp.ne.s32.totalorder %s1368_s26, 0 }
  0x40   : > { %s1235_s10 = sand.u32 (!%p1373_p12), 1, %s1076_s19   ;;  %p1374_p1 = scmp.ne.s32.totalorder (!%p1373_p12), %s1366_s24, 0 }
  0x41   : > { %226 = sbr.rel (%p1373_p12) target bundleno = 823 (0x337), region = 32  ;;  %s772_s11 = sshll.u32 (!%p1373_p12), %s1235_s10, 3 }
  0x42   : > { %s229_s12 = scalar_lea.sflag (!%p1373_p12), [#allocation3], %s1235_s10  ;;  %s232_s23 = scalar_lea.vmem (!%p1373_p12), [#allocation2], %s772_s11 }
  0x46   : > { %1055 = dma.done.wait (%p1374_p1), %s229_s12, 128  }
  0x47   : > { %1057 = vsyncadd (%p1374_p1), %s229_s12, 4294967168  ;;  %p1375_p4 = scmp.eq.s32.totalorder %s1147_s22, 0 }
  0x49   : > { %1059 = dma.done.wait (%p1375_p4), [#allocation6], 512   ;;  %p1376_p6 = pmov %p1375_p4 }
  0x4a   : > { %v1090_v0 = vmov 0.0   ;;  %vm1091_vm0 = vmmov 0   ;;  %v275_v1 = vld [vmem:[#allocation5 + $0x18] sm:$0xff]  ;;  %v274_v2 = vld [vmem:[#allocation5 + $0x10] sm:$0xff]  ;;  %v273_v3 = vld [vmem:[#allocation5 + $0x8] sm:$0xff]  ;;  %vm283_vm1 = vcmask 261120   ;;  %v359_v10 = vlaneseq }
  0x4b   : > { %1061 = vsyncadd (%p1376_p6), [#allocation6], 4294966784  ;;  %802 = vmatprep.subr.mxu0 %v1090_v0  ;;  %810 = vmatprep.mubr.msk.f32.mxu0 %vm1091_vm0, %v1090_v0  ;;  %v272_v4 = vld [vmem:[#allocation5] sm:$0xff]  ;;  %v271_v5 = vld [vmem:[%s232_s23] sm:$0xff]  ;;  %v1092_v13 = vmov 1.0   ;;  %vm436_vm3 = vcmask 64512  }
  0x4c   : > { %813 = vmatprep.subr.mxu1 %v1090_v0  ;;  %821 = vmatprep.mubr.msk.f32.mxu1 %vm1091_vm0, %v1090_v0  ;;  %v775_v6 = vld [vmem:[%s1357_s2] ss:$0 sm:$0xff]  ;;  %v360_v11 = vand.u32 127, %v359_v10  ;;  %s1259_s8 = scalar_lea.vmem [#allocation7], %s772_s11  ;;  %s264_s6 = scalar_lea.vmem [#allocation8], %s1235_s10 }
  0x4d   : > { %803 = vmatpush3.msra.mxu0 %v275_v1  ;;  %814 = vmatpush3.xpose.msra.mxu1 %v275_v1  ;;  %s619_s7 = sshll.u32 %s264_s6, 4  ;;  %s589_s9 = sand.u32 1, %s1147_s22   ;;  %s1264_s7 = int_to_ptr.vmem [resolvable:$true] %s619_s7 }
  0x4e   : > { %804 = vmatprep.subr.mxu0 %v1090_v0  ;;  %815 = vmatprep.subr.mxu1 %v1090_v0  ;;  %s784_s16 = sshll.u32 %s1147_s22, 4  ;;  %s1273_s15 = scalar_lea.sflag [#allocation9], %s589_s9 }
  0x4f   : > { %805 = vmatpush3.msra.mxu0 %v274_v2  ;;  %s617_s29 = scalar_lea.hbm %s1359_s4, %s784_s16  ;;  %s960_s28 = scalar_lea.vmem %s1264_s7, 16 }
  0x50   : > { %806 = vmatprep.subr.mxu0 %v1090_v0  ;;  %p961_p8 = scmp.ne.s32.totalorder %s1264_s7, %s960_s28  ;;  %p1377_p3 = scmp.ne.s32.totalorder %s1371_s14, 0 }
  0x51   : > { %807 = vmatpush3.msra.mxu0 %v273_v3  ;;  %816 = vmatpush3.xpose.msra.mxu1 %v274_v2  ;;  %s1093_s11 = smov [#allocation8]  }
  0x52   : > { %808 = vmatprep.subr.mxu0 %v1090_v0  ;;  %817 = vmatprep.subr.mxu1 %v1090_v0  ;;  %p962_p11 = pnand %p961_p8, %p1377_p3  ;;  %s964_s12 = sshll.u32 %s1093_s11, 4  ;;  %s965_s12 = int_to_ptr.vmem [resolvable:$false] %s964_s12 }
  0x53   : > { %809 = vmatpush3.msra.mxu0 %v272_v4  ;;  %s966_s23 = scalar_lea.vmem %s965_s12, 32  ;;  %p967_p10 = scmp.lt.s32.totalorder %s1264_s7, %s965_s12 }
  0x54   : > { %811 = vmatmul.mubr.msk.f32.vlgmr.msra.gmra.mxu0 %vm283_vm1, %v271_v5  ;;  %824 = vmatprep.subr.mxu0 %v1090_v0  ;;  %p963_p7 = pneg %p962_p11  ;;  %p968_p2 = scmp.lt.s32.totalorder %s966_s23, %s960_s28 }
  0x55   : > { %818 = vmatpush3.xpose.msra.mxu1 %v273_v3  ;;  %826 = vmatprep.mubr.msk.f32.mxu0 %vm1091_vm0, %v1090_v0 }
  0x56   : > { %819 = vmatprep.subr.mxu1 %v1090_v0  ;;  %p969_p13 = por %p968_p2, %p967_p10 }
  0x58   : > { %p970_p0 = pnand %p969_p13, %p963_p7 }
  0x59   : > { %820 = vmatpush3.xpose.msra.mxu1 %v272_v4 }
 0x114   : > { %v353_v7 = vpop.f32.mrf.mxu0 }
 0x115   : > { %v354_v8 = vadd.f32 %v775_v6, %v353_v7 }
 0x116   : > { %v812_v9 = vpop.f32.mrf.mxu0 }
 0x117   : > { %357 = vmax.index.xlane.f32.xlu0 %v354_v8 }
 0x1a0   : > { %v358_v12 = vpop.xlane.xlu0 %357 }
 0x1a1   : > { %vm361_vm2 = vcmp.eq.s32.totalorder %v360_v11, %v358_v12 }
 0x1a2   : > { %822 = vmatmul.mubr.msk.f32.vlgmr.msra.gmra.mxu1 %vm361_vm2, %v1092_v13  ;;  %825 = vmatpush3.msk.msra.mxu0 %vm361_vm2, %v1092_v13 }
 0x1a3   : > { %829 = vmatprep.subr.mxu0 %v1090_v0  ;;  %827 = vmatmul.mubr.msk.f32.vlgmr.msra.gmra.mxu0 %vm436_vm3, %v1092_v13 }
 0x1a4   : > { %831 = vmatprep.mubr.msk.f32.mxu0 %vm1091_vm0, %v1090_v0 }
 0x262   : > { %v430_v14 = vpop.f32.mrf.mxu1 }
 0x263   : > { %434 = vst.msk [vmem:[%s1259_s8] sm:$0xff] %vm283_vm1, %v430_v14  ;;  %v435_v15 = vsub.f32 %v430_v14, %v271_v5  ;;  %v506_v18 = vpop.f32.mrf.mxu0 }
 0x264   : > { %v823_v16 = vpop.f32.mrf.mxu1  ;;  %510 = vst [vmem:[%s264_s6] sm:$0x1] %v506_v18 }
 0x265   : > { %v511_v17 = vmul.f32 %v435_v15, %v435_v15  ;;  %v828_v19 = vpop.f32.mrf.mxu0 }
 0x267   : > { %830 = vmatpush3.msra.mxu0 %v511_v17 }
 0x268   : > { %832 = vmatmul.mubr.msk.f32.vlgmr.msra.gmra.mxu0 %vm436_vm3, %v1092_v13 }
 0x269   : > { %973 = shalt.err (!%p970_p0)
}
 0x26a   : > { %s974_s24 = scalar_lea.hbm %s617_s29, 16  ;;  %s978_s9 = scalar_lea.hbm %s1359_s4, 32 }
 0x26b   : > { %p975_p5 = scmp.ne.s32.totalorder %s617_s29, %s974_s24  ;;  %p979_p1 = scmp.lt.s32.totalorder %s617_s29, %s1359_s4 }
 0x26c   : > { %p980_p4 = scmp.lt.s32.totalorder %s978_s9, %s974_s24 }
 0x26d   : > { %p976_p9 = pnand %p975_p5, %p1377_p3 }
 0x26e   : > { %p981_p6 = por %p980_p4, %p979_p1 }
 0x26f   : > { %p977_p12 = pneg %p976_p9 }
 0x271   : > { %p982_p8 = pnand %p981_p6, %p977_p12 }
 0x273   : > { %985 = shalt.err (!%p982_p8)
}
 0x274   : > { %841 = dma.vmem_to_hbm [thread:$0]  (%p1377_p3), %s1264_s7, 16, %s617_s29, %s1273_s15  }
 0x275   : > { %s783_s28 = sshll.u32 %s1147_s22, 7  ;;  %s606_s26 = sshll.u32 %s1259_s8, 4  ;;  %s607_s26 = int_to_ptr.vmem [resolvable:$true] %s606_s26 }
 0x276   : > { %s604_s23 = scalar_lea.hbm %s1358_s3, %s783_s28  ;;  %s585_s24 = scalar_lea.sflag [#allocation4], %s1235_s10 }
 0x277   : > { %s986_s6 = scalar_lea.vmem %s607_s26, 128  ;;  %s1094_s9 = smov [#allocation7]  }
 0x278   : > { %p987_p11 = scmp.ne.s32.totalorder %s607_s26, %s986_s6  ;;  %s990_s27 = sshll.u32 %s1094_s9, 4  ;;  %s991_s27 = int_to_ptr.vmem [resolvable:$false] %s990_s27 }
 0x279   : > { %s992_s17 = scalar_lea.vmem %s991_s27, 256  ;;  %p993_p2 = scmp.lt.s32.totalorder %s607_s26, %s991_s27 }
 0x27a   : > { %p988_p7 = pnand %p987_p11, %p1377_p3  ;;  %p994_p13 = scmp.lt.s32.totalorder %s992_s17, %s986_s6 }
 0x27c   : > { %p989_p10 = pneg %p988_p7  ;;  %p995_p0 = por %p994_p13, %p993_p2 }
 0x27e   : > { %p996_p5 = pnand %p995_p0, %p989_p10 }
 0x280   : > { %999 = shalt.err (!%p996_p5)
}
 0x281   : > { %s1000_s7 = scalar_lea.hbm %s604_s23, 128  ;;  %s1004_s28 = scalar_lea.hbm %s1358_s3, 256 }
 0x282   : > { %p1001_p9 = scmp.ne.s32.totalorder %s604_s23, %s1000_s7  ;;  %p1005_p4 = scmp.lt.s32.totalorder %s604_s23, %s1358_s3 }
 0x283   : > { %p1006_p6 = scmp.lt.s32.totalorder %s1004_s28, %s1000_s7 }
 0x284   : > { %p1002_p12 = pnand %p1001_p9, %p1377_p3 }
 0x285   : > { %p1007_p8 = por %p1006_p6, %p1005_p4 }
 0x286   : > { %p1003_p1 = pneg %p1002_p12 }
 0x288   : > { %p1008_p11 = pnand %p1007_p8, %p1003_p1 }
 0x28a   : > { %1011 = shalt.err (!%p1008_p11)
}
 0x28b   : > { %840 = dma.vmem_to_hbm [thread:$0]  (%p1377_p3), %s607_s26, 128, %s604_s23, %s585_s24   ;;  %vm582_vm4 = vcmask 253952  }
 0x28c   : > { %s270_s6 = scalar_lea.vmem [#allocation10], %s1235_s10  ;;  %s1316_s8 = scalar_lea.hbm %s1360_s5, %s784_s16 }
 0x28d   : > { %s632_s9 = sshll.u32 %s270_s6, 4  ;;  %s1095_s29 = smov [#allocation10]   ;;  %s633_s9 = int_to_ptr.vmem [resolvable:$true] %s632_s9 }
 0x28e   : > { %s1012_s7 = scalar_lea.vmem %s633_s9, 16  ;;  %s1016_s23 = sshll.u32 %s1095_s29, 4  ;;  %s1017_s23 = int_to_ptr.vmem [resolvable:$false] %s1016_s23 }
 0x28f   : > { %p1013_p7 = scmp.ne.s32.totalorder %s633_s9, %s1012_s7  ;;  %s1018_s10 = scalar_lea.vmem %s1017_s23, 32 }
 0x290   : > { %p1019_p13 = scmp.lt.s32.totalorder %s633_s9, %s1017_s23  ;;  %p1020_p0 = scmp.lt.s32.totalorder %s1018_s10, %s1012_s7 }
 0x291   : > { %p1014_p10 = pnand %p1013_p7, %p1377_p3 }
 0x292   : > { %p1021_p5 = por %p1020_p0, %p1019_p13 }
 0x293   : > { %p1015_p2 = pneg %p1014_p10 }
 0x295   : > { %p1022_p9 = pnand %p1021_p5, %p1015_p2 }
 0x328   : > { %v578_v20 = vpop.f32.mrf.mxu0 }
 0x329   : > { %583 = vst.msk [vmem:[%s270_s6] sm:$0x1] %vm582_vm4, %v578_v20 }
 0x32a   : > { %v833_v21 = vpop.f32.mrf.mxu0 }
 0x32b   : > { %1025 = shalt.err (!%p1022_p9)
}
 0x32c   : > { %s1026_s22 = scalar_lea.hbm %s1316_s8, 16  ;;  %s1030_s24 = scalar_lea.hbm %s1360_s5, 32 }
 0x32d   : > { %p1027_p12 = scmp.ne.s32.totalorder %s1316_s8, %s1026_s22  ;;  %p1031_p6 = scmp.lt.s32.totalorder %s1316_s8, %s1360_s5 }
 0x32e   : > { %p1032_p8 = scmp.lt.s32.totalorder %s1030_s24, %s1026_s22 }
 0x32f   : > { %p1028_p1 = pnand %p1027_p12, %p1377_p3 }
 0x330   : > { %p1033_p11 = por %p1032_p8, %p1031_p6 }
 0x331   : > { %p1029_p4 = pneg %p1028_p1 }
 0x333   : > { %p1034_p7 = pnand %p1033_p11, %p1029_p4 }
 0x335   : > { %1037 = shalt.err (!%p1034_p7)
}
 0x336   : > { %842 = dma.vmem_to_hbm [thread:$0]  (%p1377_p3), %s633_s9, 16, %s1316_s8, %s1273_s15  }
 0x337 PF: > { %s644_s12 = sand.u32 1, %s1072_s18   ;;  %p1378_p10 = scmp.ne.s32.totalorder %s1367_s25, 0 }
 0x338   : > { %p1379_p2 = scmp.ge.s32.totalorder %s1084_s21, 2  ;;  %s645_s6 = scalar_lea.sflag [#allocation4], %s644_s12 }
 0x33a   : > { %p855_p13 = pnand %p1379_p2, %p1378_p10 }
 0x33c   : > { %p856_p0 = pneg %p855_p13 }
 0x33e   : > { %1063 = dma.done.wait (%p856_p0), %s645_s6, 128  }
 0x33f   : > { %1065 = vsyncadd (%p856_p0), %s645_s6, 4294967168  ;;  %s1380_s27 = sadd.s32 4294967294, %s1084_s21  }
 0x340   : > { %s653_s17 = sand.u32 1, %s1380_s27  }
 0x341   : > { %s654_s7 = scalar_lea.sflag [#allocation9], %s653_s17 }
 0x342   : > { %1067 = dma.done.wait (%p856_p0), %s654_s7, 32  }
 0x343   : > { %1069 = vsyncadd (%p856_p0), %s654_s7, 4294967264  ;;  %p23_p3 = scmp.ge.s32.totalorder %s1182_s30, 4   ;;  %s1381_s18 = smov %s1076_s19 }
 0x344   : > { %s1382_s19 = smov %s1080_s20  ;;  %s1383_s20 = smov %s1199_s13 }
 0x345   : > { %s1384_s21 = smov %s1182_s30  ;;  %25 = sbr.rel (!%p23_p3) target bundleno = 8 (0x8), region = 113 }
 0x34a   :  { %666 = vsyncpa [#allocation3], 1 }
 0x34b   :  { %668 = vsyncpa [#allocation3 + $0x1], 1 }
 0x34c   :  { %669 = vsyncpa [#allocation6], 1 }
 0x34d   :  { %670 = vsyncpa [#allocation4], 1 }
 0x34e   :  { %672 = vsyncpa [#allocation4 + $0x1], 1 }
 0x34f   :  { %673 = vsyncpa [#allocation9], 1 }
 0x350   :  { %675 = vsyncpa [#allocation9 + $0x1], 1 }

</bundles_post_ra>
